<compile_context>
chip_gen: v6e
topology: v6e:2x2x1
jax: 0.10.0
libtpu: 0.0.40
codegen_flags: <defaults>
</compile_context>

<pallas_src>
import functools

import jax
import jax.numpy as jnp
from jax.experimental import pallas as pl
from jax.experimental.pallas import tpu as pltpu


# ----------------------------- block selection -------------------------------
def _choose_blocks(B, D, K, Sp, x_itemsize, w_itemsize, out_itemsize,
                   budget_bytes=24 << 20, nb_cap=8):
    """Pick (tile_d, nb): full-D tiles preferred, several images per step."""

    def need(tile_d, nb):
        # double-buffered VMEM footprint of one grid step
        return 2 * (nb * K * Sp * x_itemsize          # patch block
                    + tile_d * K * w_itemsize          # weight tile
                    + tile_d * Sp * 4                  # f32 addend tile
                    + nb * tile_d * Sp * out_itemsize)  # output block

    # tile_d: full D whenever it fits -> nd == 1, x stream fetched exactly once.
    if need(D, 1) <= budget_bytes:
        tile_d = D
    else:
        tile_d = None
        for pref in (256, 128, 16, 8, 1):   # MXU-/sublane-friendly multiples
            for t in range(D - 1, 0, -1):
                if D % t == 0 and t % pref == 0 and need(t, 1) <= budget_bytes:
                    tile_d = t
                    break
            if tile_d is not None:
                break
        if tile_d is None:       # pathological; let vmem_limit deal with it
            tile_d = D

    # nb: batch images per step to amortize per-step overhead; keep >= 2 batch
    # steps so megacore (v7x: 2 TensorCores) still gets parallel grid work.
    nb = 1
    for cand in range(min(B, nb_cap), 0, -1):
        if B % cand:
            continue
        if need(tile_d, cand) > budget_bytes:
            continue
        if B > 1 and (B // cand) < 2:
            continue
        nb = cand
        break

    return tile_d, nb, need(tile_d, nb)


# ----------------------------- fused kernel ----------------------------------
def _fused_patch_proj_kernel(w_ref, x_ref, add_ref, o_ref, *, nb):
    # w_ref:   (tile_d, K)       conv-weight tile (f32 or bf16)
    # x_ref:   (nb, K, Sp)       patches of nb images, K-major (f32 or bf16)
    # add_ref: (tile_d, Sp)      bias + scrambled positional embedding (f32)
    # o_ref:   (nb, tile_d, Sp)  output: channels x spatial positions
    w = w_ref[...]
    add = add_ref[...]
    # Short unrolled loop: nb MXU matmuls per grid step with a resident weight
    # tile; amortizes the ~0.35 us per-step grid overhead.
    for i in range(nb):
        acc = jnp.dot(w, x_ref[i], preferred_element_type=jnp.float32)
        o_ref[i] = (acc + add).astype(o_ref.dtype)


def fused_patch_projection(x_km, w_mat, addend, *, out_dtype=jnp.float32,
                           tile_d=None, nb=None, allow_input_fusion=True):
    """Conv-as-matmul with fused bias + positional-embedding epilogue.

    x_km:   (B, K, Sp)   patches, K-major (K = C*P*P, Sp = lane-padded Hp*Wp)
    w_mat:  (D, K)       conv weight reshaped
    addend: (D, Sp)      f32 bias[:, None] (+ pos_emb[1:].reshape(D, S), padded)
    returns (B, D, Sp)   == NCHW conv output + epilogue, per-image row-major
    """
    B, K, Sp = x_km.shape
    D, K2 = w_mat.shape
    assert K == K2 and addend.shape == (D, Sp), (x_km.shape, w_mat.shape, addend.shape)

    xi = jnp.dtype(x_km.dtype).itemsize
    wi = jnp.dtype(w_mat.dtype).itemsize
    oi = jnp.dtype(out_dtype).itemsize

    auto_tile_d, auto_nb, _ = _choose_blocks(B, D, K, Sp, xi, wi, oi)
    tile_d = auto_tile_d if tile_d is None else tile_d
    nb = auto_nb if nb is None else nb
    assert D % tile_d == 0, (D, tile_d)
    assert B % nb == 0, (B, nb)
    nd, n_bsteps = D // tile_d, B // nb

    # Explicit scoped-VMEM request derived from the actual block sizes:
    # v5e default is 16 MiB; v7x physical VMEM is 64 MiB -> cap at 56 MiB.
    vmem_need = 2 * (nb * K * Sp * xi + tile_d * K * wi
                     + tile_d * Sp * 4 + nb * tile_d * Sp * oi)
    vmem_limit = int(min(max(vmem_need * 5 // 4 + (1 << 20), 32 << 20), 56 << 20))

    # Real per-stream traffic: x is fetched nd times (once when nd == 1),
    # weights / addend once per channel tile, output written once.
    cost = pl.CostEstimate(
        flops=2 * B * D * K * Sp + B * D * Sp,
        transcendentals=0,
        bytes_accessed=(nd * B * K * Sp * xi + D * K * wi + D * Sp * 4
                        + B * D * Sp * oi),
    )

    kernel = functools.partial(_fused_patch_proj_kernel, nb=nb)

    def call(use_input_fusion):
        return pl.pallas_call(
            kernel,
            out_shape=jax.ShapeDtypeStruct((B, D, Sp), out_dtype),
            grid=(nd, n_bsteps),
            in_specs=[
                pl.BlockSpec((tile_d, K), lambda j, b: (j, 0)),      # weights
                pl.BlockSpec((nb, K, Sp), lambda j, b: (b, 0, 0)),   # nb images
                pl.BlockSpec((tile_d, Sp), lambda j, b: (j, 0)),     # bias+pos
            ],
            out_specs=pl.BlockSpec((nb, tile_d, Sp), lambda j, b: (b, j, 0)),
            compiler_params=pltpu.CompilerParams(
                dimension_semantics=("parallel", "parallel"),
                vmem_limit_bytes=vmem_limit,
                allow_input_fusion=(
                    [False, True, False] if use_input_fusion else None)),
            cost_estimate=cost,
        )(w_mat, x_km, addend)

    if allow_input_fusion:
        try:
            # Let XLA fuse the patchify reshape/transpose (+ cast/pad) producer
            # into the x operand of the custom call instead of materializing it.
            return call(True)
        except Exception:   # conservative fallback if the backend rejects it
            pass
    return call(False)


# ----------------------------- forward (glue + kernel) -----------------------
def patching_and_embedding_forward(images, params, *, patch_size,
                                   embedding=True,
                                   compute_dtype=jnp.bfloat16,
                                   out_dtype=jnp.float32,
                                   allow_input_fusion=True,
                                   tile_d=None, nb=None):
    B, C, H, W = images.shape
    P = patch_size
    Hp, Wp = H // P, W // P
    S = Hp * Wp
    K = C * P * P
    D = params["conv_w"].shape[0]

    # 'valid' conv truncates any remainder rows/cols.
    images = images[:, :, : Hp * P, : Wp * P]

    # Patch extraction, K-major, so the Pallas matmul directly produces the
    # NCHW layout the PyTorch raw-reshape expects.  With allow_input_fusion the
    # transpose can be fused into the pallas_call operand instead of being a
    # separate HBM pass.
    x_km = (images.reshape(B, C, Hp, P, Wp, P)
                  .transpose(0, 1, 3, 5, 2, 4)
                  .reshape(B, K, S))

    w_mat = params["conv_w"].reshape(D, K)

    # Fused epilogue addend (f32): bias (+ positional embeddings pre-permuted
    # into the kernel's (channel, spatial) layout — a free reshape, no gather).
    addend = params["conv_b"].astype(jnp.float32).reshape(D, 1)
    if embedding:
        addend = addend + params["pos_emb"][1:, :].astype(jnp.float32).reshape(D, S)
    else:
        addend = jnp.broadcast_to(addend, (D, S))

    # Lane-dense matmul N: pad S (e.g. ViT's 196) to a multiple of 128 so the
    # v6e/v7x 256-wide MXU is better filled and output stores are unmasked.
    Sp = S
    if S > 128 and S % 128 != 0:
        Sp = ((S + 127) // 128) * 128
    if Sp != S:
        x_km = jnp.pad(x_km, ((0, 0), (0, 0), (0, Sp - S)))
        addend = jnp.pad(addend, ((0, 0), (0, Sp - S)))

    z = fused_patch_projection(
        x_km.astype(compute_dtype), w_mat.astype(compute_dtype), addend,
        out_dtype=out_dtype, tile_d=tile_d, nb=nb,
        allow_input_fusion=allow_input_fusion)           # (B, D, Sp)

    if Sp != S:
        z = z[:, :, :S]                                  # pad columns dropped

    if not embedding:
        # conv output permuted to channels-last: (B, Hp, Wp, D)
        return z.reshape(B, D, Hp, Wp).transpose(0, 2, 3, 1)

    # Exact reproduction of torch.reshape(patches, (B, Hp*Wp, D)) on NCHW data:
    # a free bitcast reshape (no transpose), pos already added in the kernel.
    patch_tokens = z.reshape(B, S, D)

    cls_row = (params["class_token"].reshape(1, 1, D)
               + params["pos_emb"][0].reshape(1, 1, D)).astype(z.dtype)
    cls_row = jnp.broadcast_to(cls_row, (B, 1, D))
    # TODO(synk): fold this concat into the kernel via an aliased flattened
    # output + pl.Element row offsets; kept in XLA for lowering robustness.
    return jnp.concatenate([cls_row, patch_tokens], axis=1)


# ----------------------------- reference (plain JAX) -------------------------
def reference_forward(images, params, *, patch_size, embedding=True):
    B, C, H, W = images.shape
    P = patch_size
    D = params["conv_w"].shape[0]
    Hp, Wp = H // P, W // P
    patches = jax.lax.conv_general_dilated(
        images, params["conv_w"], window_strides=(P, P), padding="VALID",
        dimension_numbers=("NCHW", "OIHW", "NCHW"),
    ) + params["conv_b"].reshape(1, D, 1, 1)
    if not embedding:
        return patches.transpose(0, 2, 3, 1)
    patches_flattened = patches.reshape(B, Hp * Wp, D)  # raw reshape, as PyTorch
    cls = jnp.broadcast_to(params["class_token"], (B, 1, D))
    tokens = jnp.concatenate([cls, patches_flattened], axis=1)
    return tokens + params["pos_emb"][None, :, :]


if __name__ == "__main__":
    # Module config: project_dim=32, input_shape=(4, 16, 16), patch_size=4
    B, C, H, W = 2, 4, 16, 16
    P = 4
    D = 32
    S = (H // P) * (W // P)  # 16 patches

    key = jax.random.PRNGKey(0)
    k1, k2, k3, k4, k5 = jax.random.split(key, 5)
    params = {
        "conv_w": 0.05 * jax.random.normal(k1, (D, C, P, P), jnp.float32),
        "conv_b": 0.05 * jax.random.normal(k2, (D,), jnp.float32),
        "class_token": jax.random.uniform(k3, (1, 1, D), jnp.float32),   # torch.rand
        "pos_emb": jax.random.normal(k4, (S + 1, D), jnp.float32),       # nn.Embedding weight
    }
    images = jax.random.normal(k5, (B, C, H, W), jnp.float32)

    ref = reference_forward(images, params, patch_size=P)

    # f32 operand path (tight check).
    out = patching_and_embedding_forward(images, params, patch_size=P,
                                         compute_dtype=jnp.float32)
    out = jax.block_until_ready(out)
    assert out.shape == (B, S + 1, D), out.shape
    assert jnp.allclose(out, ref, atol=5e-4, rtol=5e-4), (
        float(jnp.max(jnp.abs(out - ref))))

    # Default bf16 MXU-operand path (f32 accumulate + f32 epilogue), loose tol.
    out_bf16 = jax.block_until_ready(
        patching_and_embedding_forward(images, params, patch_size=P))
    assert jnp.allclose(out_bf16, ref, atol=3e-2, rtol=3e-2), (
        float(jnp.max(jnp.abs(out_bf16 - ref))))

    # embedding=False path (channels-last conv output).
    out_noemb = jax.block_until_ready(
        patching_and_embedding_forward(images, params, patch_size=P,
                                       embedding=False,
                                       compute_dtype=jnp.float32))
    ref_noemb = reference_forward(images, params, patch_size=P, embedding=False)
    assert out_noemb.shape == (B, H // P, W // P, D), out_noemb.shape
    assert jnp.allclose(out_noemb, ref_noemb, atol=5e-4, rtol=5e-4), (
        float(jnp.max(jnp.abs(out_noemb - ref_noemb))))

    # Lane-padding path: S=144 (not a multiple of 128) -> padded to 256.
    H2 = W2 = 48
    S2 = (H2 // P) * (W2 // P)
    k6, k7 = jax.random.split(k5)
    params2 = dict(params)
    params2["pos_emb"] = jax.random.normal(k6, (S2 + 1, D), jnp.float32)
    images2 = jax.random.normal(k7, (B, C, H2, W2), jnp.float32)
    ref2 = reference_forward(images2, params2, patch_size=P)
    out2 = jax.block_until_ready(
        patching_and_embedding_forward(images2, params2, patch_size=P,
                                       compute_dtype=jnp.float32))
    assert out2.shape == (B, S2 + 1, D), out2.shape
    assert jnp.allclose(out2, ref2, atol=5e-4, rtol=5e-4), (
        float(jnp.max(jnp.abs(out2 - ref2))))

    print("KERNEL_OK")
</pallas_src>

<mosaic_0001>
module attributes {stable_mosaic.version = 11 : i64} {
  func.func @_fused_patch_proj_kernel(%arg0: i32, %arg1: i32, %arg2: memref<32x64xf32, #tpu.memory_space<vmem>>, %arg3: memref<1x64x16xf32, #tpu.memory_space<vmem>>, %arg4: memref<32x16xf32, #tpu.memory_space<vmem>>, %arg5: memref<1x32x16xf32, #tpu.memory_space<vmem>>) attributes {dimension_semantics = [#tpu.dimension_semantics<parallel>, #tpu.dimension_semantics<parallel>], iteration_bounds = array<i64: 1, 2>, scalar_prefetch = 0 : i64, scratch_operands = 0 : i64, tpu.core_type = #tpu.core_type<tc>, window_params = [{transform_indices = @transform_0, window_bounds = array<i64: 32, 64>}, {transform_indices = @transform_1, window_bounds = array<i64: 1, 64, 16>}, {transform_indices = @transform_2, window_bounds = array<i64: 32, 16>}, {transform_indices = @transform_3, window_bounds = array<i64: 1, 32, 16>}]} {
    %c0 = arith.constant 0 : index
    %c0_0 = arith.constant 0 : index
    %0 = vector.load %arg2[%c0, %c0_0] : memref<32x64xf32, #tpu.memory_space<vmem>>, vector<32x64xf32>
    %c0_1 = arith.constant 0 : index
    %c0_2 = arith.constant 0 : index
    %1 = vector.load %arg4[%c0_1, %c0_2] : memref<32x16xf32, #tpu.memory_space<vmem>>, vector<32x16xf32>
    %c0_3 = arith.constant 0 : index
    %c0_4 = arith.constant 0 : index
    %c0_5 = arith.constant 0 : index
    %2 = vector.load %arg3[%c0_3, %c0_4, %c0_5] : memref<1x64x16xf32, #tpu.memory_space<vmem>>, vector<1x64x16xf32>
    %3 = vector.shape_cast %2 : vector<1x64x16xf32> to vector<64x16xf32>
    %cst = arith.constant dense<0.000000e+00> : vector<32x16xf32>
    %4 = tpu.matmul %0, %3, %cst {dimension_numbers = #tpu.dot_dimension_numbers<[1], [0], [0], [1], [0, 0, 1, 1], [], []>} : vector<32x64xf32>, vector<64x16xf32>, vector<32x16xf32> -> vector<32x16xf32>
    %5 = arith.addf %4, %1 : vector<32x16xf32>
    %c0_6 = arith.constant 0 : index
    %c0_7 = arith.constant 0 : index
    %c0_8 = arith.constant 0 : index
    %6 = vector.load %arg5[%c0_6, %c0_7, %c0_8] : memref<1x32x16xf32, #tpu.memory_space<vmem>>, vector<1x32x16xf32>
    %7 = vector.shape_cast %6 : vector<1x32x16xf32> to vector<32x16xf32>
    %8 = vector.shape_cast %5 : vector<32x16xf32> to vector<1x32x16xf32>
    tpu.vector_store %arg5[%c0_6, %c0_7, %c0_8], %8 {strides = array<i32>} : memref<1x32x16xf32, #tpu.memory_space<vmem>>, vector<1x32x16xf32>,
    return
  }
  func.func @transform_0(%arg0: i32, %arg1: i32) -> (i32, i32) {
    %c0_i32 = arith.constant 0 : i32
    %c0_i32_0 = arith.constant 0 : i32
    return %arg0, %c0_i32 : i32, i32
  }
  func.func @transform_1(%arg0: i32, %arg1: i32) -> (i32, i32, i32) {
    %c0_i32 = arith.constant 0 : i32
    %c0_i32_0 = arith.constant 0 : i32
    %c0_i32_1 = arith.constant 0 : i32
    return %arg1, %c0_i32, %c0_i32_0 : i32, i32, i32
  }
  func.func @transform_2(%arg0: i32, %arg1: i32) -> (i32, i32) {
    %c0_i32 = arith.constant 0 : i32
    %c0_i32_0 = arith.constant 0 : i32
    return %arg0, %c0_i32 : i32, i32
  }
  func.func @transform_3(%arg0: i32, %arg1: i32) -> (i32, i32, i32) {
    %c0_i32 = arith.constant 0 : i32
    %c0_i32_0 = arith.constant 0 : i32
    return %arg1, %arg0, %c0_i32 : i32, i32, i32
  }
}

module attributes {stable_mosaic.version = 11 : i64} {
  func.func @_fused_patch_proj_kernel(%arg0: i32, %arg1: i32, %arg2: memref<32x64xf32, #tpu.memory_space<vmem>>, %arg3: memref<1x64x16xf32, #tpu.memory_space<vmem>>, %arg4: memref<32x16xf32, #tpu.memory_space<vmem>>, %arg5: memref<1x32x16xf32, #tpu.memory_space<vmem>>) attributes {dimension_semantics = [#tpu.dimension_semantics<parallel>, #tpu.dimension_semantics<parallel>], iteration_bounds = array<i64: 1, 2>, scalar_prefetch = 0 : i64, scratch_operands = 0 : i64, tpu.core_type = #tpu.core_type<tc>, window_params = [{transform_indices = @transform_0, window_bounds = array<i64: 32, 64>}, {transform_indices = @transform_1, window_bounds = array<i64: 1, 64, 16>}, {transform_indices = @transform_2, window_bounds = array<i64: 32, 16>}, {transform_indices = @transform_3, window_bounds = array<i64: 1, 32, 16>}]} {
    %c0 = arith.constant 0 : index
    %c0_0 = arith.constant 0 : index
    %0 = vector.load %arg2[%c0, %c0_0] : memref<32x64xf32, #tpu.memory_space<vmem>>, vector<32x64xf32>
    %c0_1 = arith.constant 0 : index
    %c0_2 = arith.constant 0 : index
    %1 = vector.load %arg4[%c0_1, %c0_2] : memref<32x16xf32, #tpu.memory_space<vmem>>, vector<32x16xf32>
    %c0_3 = arith.constant 0 : index
    %c0_4 = arith.constant 0 : index
    %c0_5 = arith.constant 0 : index
    %2 = vector.load %arg3[%c0_3, %c0_4, %c0_5] : memref<1x64x16xf32, #tpu.memory_space<vmem>>, vector<1x64x16xf32>
    %3 = vector.shape_cast %2 : vector<1x64x16xf32> to vector<64x16xf32>
    %cst = arith.constant dense<0.000000e+00> : vector<32x16xf32>
    %4 = tpu.matmul %0, %3, %cst {dimension_numbers = #tpu.dot_dimension_numbers<[1], [0], [0], [1], [0, 0, 1, 1], [], []>} : vector<32x64xf32>, vector<64x16xf32>, vector<32x16xf32> -> vector<32x16xf32>
    %5 = arith.addf %4, %1 : vector<32x16xf32>
    %c0_6 = arith.constant 0 : index
    %c0_7 = arith.constant 0 : index
    %c0_8 = arith.constant 0 : index
    %6 = vector.load %arg5[%c0_6, %c0_7, %c0_8] : memref<1x32x16xf32, #tpu.memory_space<vmem>>, vector<1x32x16xf32>
    %7 = vector.shape_cast %6 : vector<1x32x16xf32> to vector<32x16xf32>
    %8 = vector.shape_cast %5 : vector<32x16xf32> to vector<1x32x16xf32>
    tpu.vector_store %arg5[%c0_6, %c0_7, %c0_8], %8 {strides = array<i32>} : memref<1x32x16xf32, #tpu.memory_space<vmem>>, vector<1x32x16xf32>,
    return
  }
  func.func @transform_0(%arg0: i32, %arg1: i32) -> (i32, i32) {
    %c0_i32 = arith.constant 0 : i32
    %c0_i32_0 = arith.constant 0 : i32
    return %arg0, %c0_i32 : i32, i32
  }
  func.func @transform_1(%arg0: i32, %arg1: i32) -> (i32, i32, i32) {
    %c0_i32 = arith.constant 0 : i32
    %c0_i32_0 = arith.constant 0 : i32
    %c0_i32_1 = arith.constant 0 : i32
    return %arg1, %c0_i32, %c0_i32_0 : i32, i32, i32
  }
  func.func @transform_2(%arg0: i32, %arg1: i32) -> (i32, i32) {
    %c0_i32 = arith.constant 0 : i32
    %c0_i32_0 = arith.constant 0 : i32
    return %arg0, %c0_i32 : i32, i32
  }
  func.func @transform_3(%arg0: i32, %arg1: i32) -> (i32, i32, i32) {
    %c0_i32 = arith.constant 0 : i32
    %c0_i32_0 = arith.constant 0 : i32
    return %arg1, %arg0, %c0_i32 : i32, i32, i32
  }
}

</mosaic_0001>

<bundles_post_ra>
// kernel: tpu_custom_call.1
= control target key start
LH: loop header
LB: loop body
LE: loop exit
PB: predicated region body
PF: predicated region fallthrough
CT: control target
= control target key end

     0   :  { %s605_s12 = smov 0   ;;  %s607_s13 = smov 0   ;;  %s680_s0 = inlined_call_operand.vmem [shape: f32[32,64], index: 0, kind: input, shape index: {}]   ;;  %s681_s1 = inlined_call_operand.vmem [shape: f32[2,64,16], index: 1, kind: input, shape index: {}]   ;;  %s682_s2 = inlined_call_operand.vmem [shape: f32[32,16], index: 2, kind: input, shape index: {}]   ;;  %s683_s3 = inlined_call_operand.vmem [shape: f32[2,32,16], index: 3, kind: output, shape index: {}]  }
   0x1   :  { %s609_s14 = smov 0  }
   0x2 LB: > { %s22_s15 = sadd.s32 1, %s579_s13  ;;  %p474_p0 = scmp.ge.s32.totalorder %s583_s14, 1  ;;  %s583_s14 = sphi %s609_s14, %s13_s14   ;;  %s579_s13 = sphi %s607_s13, %s685_s13   ;;  %s575_s12 = sphi %s605_s12, %s684_s12  }
   0x3   : > { %p23_p1 = scmp.ge.s32.totalorder %s22_s15, 2  ;;  %p173_p2 = scmp.lt.s32.totalorder %s583_s14, 3 }
   0x5   : > { %s687_s15 = smov (%p23_p1, %s22_s15), 0  ;;  %p174_p3 = pnand %p474_p0, %p173_p2 }
   0x6   : > { %p217_p4 = scmp.lt.s32.totalorder (!%p174_p3), %s575_s12, 1 }
   0x7   : > { %177 = sbr.rel (%p174_p3) target bundleno = 230 (0xe6), region = 32 }
   0xc   : > { %v238_v0 = vld [vmem:[%s680_s0] sm:$0xff]  ;;  %vm254_vm0 = vcmask 523264   ;;  %v240_v1 = vld [vmem:[%s680_s0 + $0x10] sm:$0xff]  ;;  %s689_s12 = smov (!%p217_p4, %s575_s12), 1  ;;  %v239_v10 = vld [vmem:[%s680_s0 + $0x8] sm:$0xff]  ;;  %vm352_vm1 = vcmask 130048  }
   0xd   : > { %515 = vmatprep.mubr.msk.f32.mxu0 %vm254_vm0, %v238_v0  ;;  %518 = vmatprep.mubr.msk.f32.mxu1 %vm254_vm0, %v240_v1  ;;  %s485_s20 = sshll.u32 %s689_s12, 6  ;;  %v241_v11 = vld [vmem:[%s680_s0 + $0x18] sm:$0xff]  ;;  %s486_s28 = sshll.u32 %s689_s12, 5  ;;  %v243_v12 = vld [vmem:[%s682_s2 + $0x8] sm:$0xff]  ;;  %v242_v16 = vld [vmem:[%s682_s2] sm:$0xff] }
   0xe   : > { %s637_s23 = scalar_lea.vmem %s681_s1, %s485_s20  ;;  %v245_v13 = vld [vmem:[%s682_s2 + $0x18] sm:$0xff]  ;;  %s236_s8 = scalar_lea.vmem %s683_s3, %s486_s28  ;;  %v244_v17 = vld [vmem:[%s682_s2 + $0x10] sm:$0xff] }
   0xf   : > { %v253_v2 = vld [vmem:[%s637_s23 + $0x38] sm:$0xff]  ;;  %v252_v3 = vld [vmem:[%s637_s23 + $0x30] sm:$0xff]  ;;  %v251_v4 = vld [vmem:[%s637_s23 + $0x28] sm:$0xff] }
  0x10   : > { %499 = vmatprep.subr.mxu0 %v253_v2  ;;  %521 = vmatprep.subr.mxu1 %v253_v2  ;;  %v250_v5 = vld [vmem:[%s637_s23 + $0x20] sm:$0xff]  ;;  %v249_v6 = vld [vmem:[%s637_s23 + $0x18] sm:$0xff]  ;;  %v248_v7 = vld [vmem:[%s637_s23 + $0x10] sm:$0xff] }
  0x11   : > { %500 = vmatpush3.msra.mxu0 %v253_v2  ;;  %529 = vmatpush3.msra.mxu1 %v253_v2  ;;  %v247_v8 = vld [vmem:[%s637_s23 + $0x8] sm:$0xff]  ;;  %v246_v9 = vld [vmem:[%s637_s23] sm:$0xff] }
  0x12   : > { %501 = vmatprep.subr.mxu0 %v252_v3  ;;  %522 = vmatprep.subr.mxu1 %v252_v3 }
  0x13   : > { %502 = vmatpush3.msra.mxu0 %v252_v3  ;;  %530 = vmatpush3.msra.mxu1 %v252_v3 }
  0x14   : > { %503 = vmatprep.subr.mxu0 %v251_v4  ;;  %523 = vmatprep.subr.mxu1 %v251_v4 }
  0x15   : > { %504 = vmatpush3.msra.mxu0 %v251_v4  ;;  %531 = vmatpush3.msra.mxu1 %v251_v4 }
  0x16   : > { %505 = vmatprep.subr.mxu0 %v250_v5  ;;  %524 = vmatprep.subr.mxu1 %v250_v5 }
  0x17   : > { %506 = vmatpush3.msra.mxu0 %v250_v5  ;;  %532 = vmatpush3.msra.mxu1 %v250_v5 }
  0x18   : > { %507 = vmatprep.subr.mxu0 %v249_v6  ;;  %525 = vmatprep.subr.mxu1 %v249_v6 }
  0x19   : > { %508 = vmatpush3.msra.mxu0 %v249_v6  ;;  %533 = vmatpush3.msra.mxu1 %v249_v6 }
  0x1a   : > { %509 = vmatprep.subr.mxu0 %v248_v7  ;;  %526 = vmatprep.subr.mxu1 %v248_v7 }
  0x1b   : > { %510 = vmatpush3.msra.mxu0 %v248_v7  ;;  %534 = vmatpush3.msra.mxu1 %v248_v7 }
  0x1c   : > { %511 = vmatprep.subr.mxu0 %v247_v8  ;;  %527 = vmatprep.subr.mxu1 %v247_v8 }
  0x1d   : > { %512 = vmatpush3.msra.mxu0 %v247_v8  ;;  %535 = vmatpush3.msra.mxu1 %v247_v8 }
  0x1e   : > { %513 = vmatprep.subr.mxu0 %v246_v9  ;;  %528 = vmatprep.subr.mxu1 %v246_v9 }
  0x1f   : > { %514 = vmatpush3.msra.mxu0 %v246_v9  ;;  %536 = vmatpush3.msra.mxu1 %v246_v9 }
  0x20   : > { %516 = vmatmul.mubr.msk.f32.vlgmr.msra.gmra.mxu0 %vm254_vm0, %v239_v10  ;;  %519 = vmatmul.mubr.msk.f32.vlgmr.msra.gmra.mxu1 %vm254_vm0, %v241_v11 }
  0xe0   : > { %v517_v14 = vpop.f32.mrf.mxu0  ;;  %v520_v15 = vpop.f32.mrf.mxu1 }
  0xe1   : > { %v339_v18 = vadd.f32 %v517_v14, %v243_v12  ;;  %v349_v19 = vadd.f32 %v520_v15, %v245_v13 }
  0xe2   : > { %v333_v20 = vpop.f32.mrf.mxu0  ;;  %v343_v21 = vpop.f32.mrf.mxu1 }
  0xe3   : > { %354 = vst.msk [vmem:[%s236_s8 + $0x8] sm:$0xff] %vm352_vm1, %v339_v18  ;;  %356 = vst.msk [vmem:[%s236_s8 + $0x18] sm:$0xff] %vm352_vm1, %v349_v19  ;;  %v334_v22 = vadd.f32 %v333_v20, %v242_v16  ;;  %v344_v23 = vadd.f32 %v343_v21, %v244_v17 }
  0xe5   : > { %353 = vst.msk [vmem:[%s236_s8] sm:$0xff] %vm352_vm1, %v334_v22  ;;  %355 = vst.msk [vmem:[%s236_s8 + $0x10] sm:$0xff] %vm352_vm1, %v344_v23 }
  0xe6 PF: > { %s13_s14 = sadd.s32 1, %s583_s14   ;;  %s684_s12 = smov %s579_s13 }
  0xe7   : > { %p10_p5 = scmp.ge.s32.totalorder %s13_s14, 4   ;;  %s685_s13 = smov %s687_s15 }
  0xe9   :  { %12 = sbr.rel (!%p10_p5) target bundleno = 2 (0x2), region = 68 }

// kernel: tpu_custom_call.1
= control target key start
LH: loop header
LB: loop body
LE: loop exit
PB: predicated region body
PF: predicated region fallthrough
CT: control target
= control target key end

     0   :  { %s605_s12 = smov 0   ;;  %s607_s13 = smov 0   ;;  %s680_s0 = inlined_call_operand.vmem [shape: f32[32,64], index: 0, kind: input, shape index: {}]   ;;  %s681_s1 = inlined_call_operand.vmem [shape: f32[2,64,16], index: 1, kind: input, shape index: {}]   ;;  %s682_s2 = inlined_call_operand.vmem [shape: f32[32,16], index: 2, kind: input, shape index: {}]   ;;  %s683_s3 = inlined_call_operand.vmem [shape: f32[2,32,16], index: 3, kind: output, shape index: {}]  }
   0x1   :  { %s609_s14 = smov 0  }
   0x2 LB: > { %s22_s15 = sadd.s32 1, %s579_s13  ;;  %p474_p0 = scmp.ge.s32.totalorder %s583_s14, 1  ;;  %s583_s14 = sphi %s609_s14, %s13_s14   ;;  %s579_s13 = sphi %s607_s13, %s685_s13   ;;  %s575_s12 = sphi %s605_s12, %s684_s12  }
   0x3   : > { %p23_p1 = scmp.ge.s32.totalorder %s22_s15, 2  ;;  %p173_p2 = scmp.lt.s32.totalorder %s583_s14, 3 }
   0x5   : > { %s687_s15 = smov (%p23_p1, %s22_s15), 0  ;;  %p174_p3 = pnand %p474_p0, %p173_p2 }
   0x6   : > { %p217_p4 = scmp.lt.s32.totalorder (!%p174_p3), %s575_s12, 1 }
   0x7   : > { %177 = sbr.rel (%p174_p3) target bundleno = 230 (0xe6), region = 32 }
   0xc   : > { %v238_v0 = vld [vmem:[%s680_s0] sm:$0xff]  ;;  %vm254_vm0 = vcmask 523264   ;;  %v240_v1 = vld [vmem:[%s680_s0 + $0x10] sm:$0xff]  ;;  %s689_s12 = smov (!%p217_p4, %s575_s12), 1  ;;  %v239_v10 = vld [vmem:[%s680_s0 + $0x8] sm:$0xff]  ;;  %vm352_vm1 = vcmask 130048  }
   0xd   : > { %515 = vmatprep.mubr.msk.f32.mxu0 %vm254_vm0, %v238_v0  ;;  %518 = vmatprep.mubr.msk.f32.mxu1 %vm254_vm0, %v240_v1  ;;  %s485_s20 = sshll.u32 %s689_s12, 6  ;;  %v241_v11 = vld [vmem:[%s680_s0 + $0x18] sm:$0xff]  ;;  %s486_s28 = sshll.u32 %s689_s12, 5  ;;  %v243_v12 = vld [vmem:[%s682_s2 + $0x8] sm:$0xff]  ;;  %v242_v16 = vld [vmem:[%s682_s2] sm:$0xff] }
   0xe   : > { %s637_s23 = scalar_lea.vmem %s681_s1, %s485_s20  ;;  %v245_v13 = vld [vmem:[%s682_s2 + $0x18] sm:$0xff]  ;;  %s236_s8 = scalar_lea.vmem %s683_s3, %s486_s28  ;;  %v244_v17 = vld [vmem:[%s682_s2 + $0x10] sm:$0xff] }
   0xf   : > { %v253_v2 = vld [vmem:[%s637_s23 + $0x38] sm:$0xff]  ;;  %v252_v3 = vld [vmem:[%s637_s23 + $0x30] sm:$0xff]  ;;  %v251_v4 = vld [vmem:[%s637_s23 + $0x28] sm:$0xff] }
  0x10   : > { %499 = vmatprep.subr.mxu0 %v253_v2  ;;  %521 = vmatprep.subr.mxu1 %v253_v2  ;;  %v250_v5 = vld [vmem:[%s637_s23 + $0x20] sm:$0xff]  ;;  %v249_v6 = vld [vmem:[%s637_s23 + $0x18] sm:$0xff]  ;;  %v248_v7 = vld [vmem:[%s637_s23 + $0x10] sm:$0xff] }
  0x11   : > { %500 = vmatpush3.msra.mxu0 %v253_v2  ;;  %529 = vmatpush3.msra.mxu1 %v253_v2  ;;  %v247_v8 = vld [vmem:[%s637_s23 + $0x8] sm:$0xff]  ;;  %v246_v9 = vld [vmem:[%s637_s23] sm:$0xff] }
  0x12   : > { %501 = vmatprep.subr.mxu0 %v252_v3  ;;  %522 = vmatprep.subr.mxu1 %v252_v3 }
  0x13   : > { %502 = vmatpush3.msra.mxu0 %v252_v3  ;;  %530 = vmatpush3.msra.mxu1 %v252_v3 }
  0x14   : > { %503 = vmatprep.subr.mxu0 %v251_v4  ;;  %523 = vmatprep.subr.mxu1 %v251_v4 }
  0x15   : > { %504 = vmatpush3.msra.mxu0 %v251_v4  ;;  %531 = vmatpush3.msra.mxu1 %v251_v4 }
  0x16   : > { %505 = vmatprep.subr.mxu0 %v250_v5  ;;  %524 = vmatprep.subr.mxu1 %v250_v5 }
  0x17   : > { %506 = vmatpush3.msra.mxu0 %v250_v5  ;;  %532 = vmatpush3.msra.mxu1 %v250_v5 }
  0x18   : > { %507 = vmatprep.subr.mxu0 %v249_v6  ;;  %525 = vmatprep.subr.mxu1 %v249_v6 }
  0x19   : > { %508 = vmatpush3.msra.mxu0 %v249_v6  ;;  %533 = vmatpush3.msra.mxu1 %v249_v6 }
  0x1a   : > { %509 = vmatprep.subr.mxu0 %v248_v7  ;;  %526 = vmatprep.subr.mxu1 %v248_v7 }
  0x1b   : > { %510 = vmatpush3.msra.mxu0 %v248_v7  ;;  %534 = vmatpush3.msra.mxu1 %v248_v7 }
  0x1c   : > { %511 = vmatprep.subr.mxu0 %v247_v8  ;;  %527 = vmatprep.subr.mxu1 %v247_v8 }
  0x1d   : > { %512 = vmatpush3.msra.mxu0 %v247_v8  ;;  %535 = vmatpush3.msra.mxu1 %v247_v8 }
  0x1e   : > { %513 = vmatprep.subr.mxu0 %v246_v9  ;;  %528 = vmatprep.subr.mxu1 %v246_v9 }
  0x1f   : > { %514 = vmatpush3.msra.mxu0 %v246_v9  ;;  %536 = vmatpush3.msra.mxu1 %v246_v9 }
  0x20   : > { %516 = vmatmul.mubr.msk.f32.vlgmr.msra.gmra.mxu0 %vm254_vm0, %v239_v10  ;;  %519 = vmatmul.mubr.msk.f32.vlgmr.msra.gmra.mxu1 %vm254_vm0, %v241_v11 }
  0xe0   : > { %v517_v14 = vpop.f32.mrf.mxu0  ;;  %v520_v15 = vpop.f32.mrf.mxu1 }
  0xe1   : > { %v339_v18 = vadd.f32 %v517_v14, %v243_v12  ;;  %v349_v19 = vadd.f32 %v520_v15, %v245_v13 }
  0xe2   : > { %v333_v20 = vpop.f32.mrf.mxu0  ;;  %v343_v21 = vpop.f32.mrf.mxu1 }
  0xe3   : > { %354 = vst.msk [vmem:[%s236_s8 + $0x8] sm:$0xff] %vm352_vm1, %v339_v18  ;;  %356 = vst.msk [vmem:[%s236_s8 + $0x18] sm:$0xff] %vm352_vm1, %v349_v19  ;;  %v334_v22 = vadd.f32 %v333_v20, %v242_v16  ;;  %v344_v23 = vadd.f32 %v343_v21, %v244_v17 }
  0xe5   : > { %353 = vst.msk [vmem:[%s236_s8] sm:$0xff] %vm352_vm1, %v334_v22  ;;  %355 = vst.msk [vmem:[%s236_s8 + $0x10] sm:$0xff] %vm352_vm1, %v344_v23 }
  0xe6 PF: > { %s13_s14 = sadd.s32 1, %s583_s14   ;;  %s684_s12 = smov %s579_s13 }
  0xe7   : > { %p10_p5 = scmp.ge.s32.totalorder %s13_s14, 4   ;;  %s685_s13 = smov %s687_s15 }
  0xe9   :  { %12 = sbr.rel (!%p10_p5) target bundleno = 2 (0x2), region = 68 }

</bundles_post_ra>
